<compile_context>
chip_gen: v5e
topology: v5e:2x2
jax: 0.10.0
libtpu: 0.0.40
codegen_flags: <defaults>
</compile_context>

<pallas_src>
import functools

import jax
import jax.numpy as jnp
from jax.experimental import pallas as pl
from jax.experimental.pallas import tpu as pltpu

GAMMA = 2.0       # fixed: gamma == 2 lets us square instead of pow
EPSILON = 1e-07

_LANES = 128
_MAX_HW_TILE = 32768                   # lane-tile cap for the spatial axis
_TARGET_STEP_BYTES = 8 * 1024 * 1024   # combined input bytes moved per grid step


def _round_up(x, m):
    return ((x + m - 1) // m) * m


def _sublane_multiple(dtype):
    # Native sublane tile: 8 for 4-byte, 16 for 2-byte, 32 for 1-byte dtypes.
    return max(8, 32 // jnp.dtype(dtype).itemsize)


def _dice_plus_kernel(pred_ref, target_ref, out_ref, tp_ref, fn_ref, fp_ref,
                      *, t_hw, rem, n_hw):
    j = pl.program_id(1)

    @pl.when(j == 0)
    def _init():
        tp_ref[...] = jnp.zeros_like(tp_ref)
        fn_ref[...] = jnp.zeros_like(fn_ref)
        fp_ref[...] = jnp.zeros_like(fp_ref)

    p = jax.nn.sigmoid(pred_ref[...].astype(jnp.float32))
    p = jnp.clip(p, EPSILON, 1.0 - EPSILON)
    t = jnp.clip(target_ref[...].astype(jnp.float32), EPSILON, 1.0 - EPSILON)

    def _accumulate(p_v, t_v):
        tp_e = t_v * p_v
        fn_e = jnp.square(t_v - tp_e)      # t*(1-p) == t - t*p ; gamma==2 -> square
        fp_e = jnp.square(p_v - tp_e)      # (1-t)*p == p - t*p
        tp_ref[...] += jnp.sum(tp_e, axis=-1, keepdims=True)
        fn_ref[...] += jnp.sum(fn_e, axis=-1, keepdims=True)
        fp_ref[...] += jnp.sum(fp_e, axis=-1, keepdims=True)

    def _accumulate_masked(p_v, t_v):
        # Final spatial block is ragged: out-of-bounds lanes hold undefined
        # data (possibly NaN/Inf), so zero them with a select, not a multiply.
        col = jax.lax.broadcasted_iota(jnp.int32, p_v.shape, dimension=1)
        mask = col < rem
        _accumulate(jnp.where(mask, p_v, 0.0), jnp.where(mask, t_v, 0.0))

    if rem == t_hw:
        # H*W divides evenly into spatial blocks: no masking anywhere.
        _accumulate(p, t)
    elif n_hw == 1:
        # Single, ragged spatial block.
        _accumulate_masked(p, t)
    else:
        # Only the final spatial block can contain padded lanes.
        @pl.when(j < n_hw - 1)
        def _full():
            _accumulate(p, t)

        @pl.when(j == n_hw - 1)
        def _ragged():
            _accumulate_masked(p, t)

    @pl.when(j == n_hw - 1)
    def _finalize():
        tp = tp_ref[...]
        fn = fn_ref[...]
        fp = fp_ref[...]
        dice = (2.0 * tp + EPSILON) / (2.0 * tp + fn + fp + EPSILON)
        loss = 1.0 - dice                                      # (t_bc, 1)
        out_ref[...] = jnp.broadcast_to(loss, out_ref.shape)   # lane-dense store


def dice_plus_loss(pred, target):
    """pred, target: (B, C, H, W). Returns the (B, C, H, W) dice++ loss map (reduction='none')."""
    B, C, H, W = pred.shape
    HW = H * W
    BC = B * C

    # Keep original dtypes on the wire; cast to f32 inside the kernel.
    pred2 = pred.reshape(BC, HW)
    target2 = target.reshape(BC, HW)

    sub = max(_sublane_multiple(pred.dtype), _sublane_multiple(target.dtype))
    itemsz = jnp.dtype(pred.dtype).itemsize + jnp.dtype(target.dtype).itemsize

    # Spatial (lane) tile.
    t_hw = min(_round_up(HW, _LANES), _MAX_HW_TILE)
    n_hw = pl.cdiv(HW, t_hw)
    rem = HW - (n_hw - 1) * t_hw        # valid lanes in the final spatial block

    # Adaptive sublane (B*C) tile: ~_TARGET_STEP_BYTES of input per grid step,
    # rounded to the native sublane multiple, capped so the parallel BC axis
    # keeps >= 2 blocks when possible (2-TensorCore sharding).
    t_bc = max(sub, (_TARGET_STEP_BYTES // (t_hw * itemsz)) // sub * sub)
    t_bc = min(t_bc, _round_up(BC, sub))
    if t_bc >= BC and BC > sub:
        t_bc = _round_up(pl.cdiv(BC, 2), sub)
    n_bc = pl.cdiv(BC, t_bc)

    grid = (n_bc, n_hw)

    kernel = functools.partial(_dice_plus_kernel, t_hw=t_hw, rem=rem, n_hw=n_hw)

    in_spec = pl.BlockSpec((t_bc, t_hw), lambda i, j: (i, j))
    out_spec = pl.BlockSpec((t_bc, _LANES), lambda i, j: (i, 0))

    cost = pl.CostEstimate(
        flops=20 * BC * HW,
        transcendentals=BC * HW,        # one exp per element (sigmoid)
        bytes_accessed=itemsz * BC * HW + n_bc * t_bc * _LANES * 4,
    )

    # Double-buffered inputs + output + scratch, with headroom; set explicitly
    # so larger-than-default tiles also compile under v5e's 16 MiB default.
    vmem_bytes = 2 * t_bc * t_hw * itemsz + 2 * t_bc * _LANES * 4 + 3 * t_bc * 4
    vmem_limit = int(min(max(2 * vmem_bytes, 16 * 2**20), 48 * 2**20))

    loss_blk = pl.pallas_call(
        kernel,
        out_shape=jax.ShapeDtypeStruct((n_bc * t_bc, _LANES), jnp.float32),
        grid_spec=pltpu.PrefetchScalarGridSpec(
            num_scalar_prefetch=0,
            grid=grid,
            in_specs=[in_spec, in_spec],
            out_specs=out_spec,
            scratch_shapes=[pltpu.VMEM((t_bc, 1), jnp.float32)] * 3,
        ),
        compiler_params=pltpu.CompilerParams(
            dimension_semantics=("parallel", "arbitrary"),
            vmem_limit_bytes=vmem_limit,
        ),
        cost_estimate=cost,
    )(pred2, target2)

    loss = loss_blk[:BC, 0].reshape(B, C)
    # reduction='none': expand the per-(b,c) loss over the spatial map in the
    # wrapper (cheap XLA broadcast) instead of storing the redundant map from
    # the kernel.
    return jnp.broadcast_to(loss[:, :, None, None], (B, C, H, W)).astype(jnp.float32)


def _reference(pred, target):
    p = jax.nn.sigmoid(pred.astype(jnp.float32))
    p = jnp.clip(p, EPSILON, 1.0 - EPSILON)
    t = jnp.clip(target.astype(jnp.float32), EPSILON, 1.0 - EPSILON)
    tp = jnp.sum(t * p, axis=(2, 3))
    fn = jnp.sum(jnp.square(t * (1.0 - p)), axis=(2, 3))
    fp = jnp.sum(jnp.square((1.0 - t) * p), axis=(2, 3))
    dice = (2.0 * tp + EPSILON) / (2.0 * tp + fn + fp + EPSILON)
    loss = 1.0 - dice
    return jnp.broadcast_to(loss[:, :, None, None], pred.shape)


if __name__ == "__main__":
    key = jax.random.PRNGKey(0)

    # Case 1: aligned shapes (no ragged blocks).
    B, C, H, W = 2, 4, 16, 16
    k1, k2, k3, k4 = jax.random.split(key, 4)
    pred = jax.random.normal(k1, (B, C, H, W), dtype=jnp.float32)        # logits
    target = (jax.random.uniform(k2, (B, C, H, W)) > 0.5).astype(jnp.float32)
    out = jax.block_until_ready(dice_plus_loss(pred, target))
    assert out.shape == (B, C, H, W)
    assert jnp.allclose(out, _reference(pred, target), atol=1e-5, rtol=1e-5), "mismatch (aligned)"

    # Case 2: unaligned shapes (exercises ragged HW-lane masking and ragged BC rows).
    B2, C2, H2, W2 = 3, 3, 10, 10
    pred2 = jax.random.normal(k3, (B2, C2, H2, W2), dtype=jnp.float32)
    target2 = (jax.random.uniform(k4, (B2, C2, H2, W2)) > 0.5).astype(jnp.float32)
    out2 = jax.block_until_ready(dice_plus_loss(pred2, target2))
    assert out2.shape == (B2, C2, H2, W2)
    assert jnp.allclose(out2, _reference(pred2, target2), atol=1e-5, rtol=1e-5), "mismatch (ragged)"

    print("KERNEL_OK")
</pallas_src>

<mosaic_0001>
module attributes {stable_mosaic.version = 11 : i64} {
  func.func @_dice_plus_kernel(%arg0: i32, %arg1: i32, %arg2: memref<8x256xf32, #tpu.memory_space<vmem>>, %arg3: memref<8x256xf32, #tpu.memory_space<vmem>>, %arg4: memref<8x128xf32, #tpu.memory_space<vmem>>, %arg5: memref<8x1xf32, #tpu.memory_space<vmem>>, %arg6: memref<8x1xf32, #tpu.memory_space<vmem>>, %arg7: memref<8x1xf32, #tpu.memory_space<vmem>>) attributes {dimension_semantics = [#tpu.dimension_semantics<parallel>, #tpu.dimension_semantics<arbitrary>], iteration_bounds = array<i64: 1, 1>, scalar_prefetch = 0 : i64, scratch_operands = 3 : i64, tpu.core_type = #tpu.core_type<tc>, window_params = [{transform_indices = @transform_0, window_bounds = array<i64: 8, 256>}, {transform_indices = @transform_1, window_bounds = array<i64: 8, 256>}, {transform_indices = @transform_2, window_bounds = array<i64: 8, 128>}]} {
    %c0_i32 = arith.constant 0 : i32
    %0 = arith.cmpi eq, %arg1, %c0_i32 : i32
    %1 = arith.extui %0 : i1 to i32
    %c0_i32_0 = arith.constant 0 : i32
    %2 = arith.cmpi ne, %1, %c0_i32_0 : i32
    scf.if %2 {
      %cst_25 = arith.constant 0.000000e+00 : f32
      %41 = vector.broadcast %cst_25 : f32 to vector<8x1xf32>
      %c0_26 = arith.constant 0 : index
      %c0_27 = arith.constant 0 : index
      %42 = vector.load %arg5[%c0_26, %c0_27] : memref<8x1xf32, #tpu.memory_space<vmem>>, vector<8x1xf32>
      tpu.vector_store %arg5[%c0_26, %c0_27], %41 {strides = array<i32>} : memref<8x1xf32, #tpu.memory_space<vmem>>, vector<8x1xf32>,
      %cst_28 = arith.constant 0.000000e+00 : f32
      %43 = vector.broadcast %cst_28 : f32 to vector<8x1xf32>
      %c0_29 = arith.constant 0 : index
      %c0_30 = arith.constant 0 : index
      %44 = vector.load %arg6[%c0_29, %c0_30] : memref<8x1xf32, #tpu.memory_space<vmem>>, vector<8x1xf32>
      tpu.vector_store %arg6[%c0_29, %c0_30], %43 {strides = array<i32>} : memref<8x1xf32, #tpu.memory_space<vmem>>, vector<8x1xf32>,
      %cst_31 = arith.constant 0.000000e+00 : f32
      %45 = vector.broadcast %cst_31 : f32 to vector<8x1xf32>
      %c0_32 = arith.constant 0 : index
      %c0_33 = arith.constant 0 : index
      %46 = vector.load %arg7[%c0_32, %c0_33] : memref<8x1xf32, #tpu.memory_space<vmem>>, vector<8x1xf32>
      tpu.vector_store %arg7[%c0_32, %c0_33], %45 {strides = array<i32>} : memref<8x1xf32, #tpu.memory_space<vmem>>, vector<8x1xf32>,
    } else {
    }
    %c0 = arith.constant 0 : index
    %c0_1 = arith.constant 0 : index
    %3 = vector.load %arg2[%c0, %c0_1] : memref<8x256xf32, #tpu.memory_space<vmem>>, vector<8x256xf32>
    %4 = arith.negf %3 : vector<8x256xf32>
    %5 = math.exp %4 : vector<8x256xf32>
    %cst = arith.constant 1.000000e+00 : f32
    %6 = vector.broadcast %cst : f32 to vector<8x256xf32>
    %7 = arith.addf %6, %5 : vector<8x256xf32>
    %8 = arith.divf %6, %7 : vector<8x256xf32>
    %cst_2 = arith.constant 1.000000e-07 : f32
    %cst_3 = arith.constant 0.99999988 : f32
    %9 = vector.broadcast %cst_2 : f32 to vector<8x256xf32>
    %10 = arith.maximumf %9, %8 : vector<8x256xf32>
    %11 = vector.broadcast %cst_3 : f32 to vector<8x256xf32>
    %12 = arith.minimumf %11, %10 : vector<8x256xf32>
    %c0_4 = arith.constant 0 : index
    %c0_5 = arith.constant 0 : index
    %13 = vector.load %arg3[%c0_4, %c0_5] : memref<8x256xf32, #tpu.memory_space<vmem>>, vector<8x256xf32>
    %cst_6 = arith.constant 1.000000e-07 : f32
    %cst_7 = arith.constant 0.99999988 : f32
    %14 = vector.broadcast %cst_6 : f32 to vector<8x256xf32>
    %15 = arith.maximumf %14, %13 : vector<8x256xf32>
    %16 = vector.broadcast %cst_7 : f32 to vector<8x256xf32>
    %17 = arith.minimumf %16, %15 : vector<8x256xf32>
    %18 = arith.mulf %17, %12 : vector<8x256xf32>
    %19 = arith.subf %17, %18 : vector<8x256xf32>
    %20 = arith.mulf %19, %19 : vector<8x256xf32>
    %21 = arith.subf %12, %18 : vector<8x256xf32>
    %22 = arith.mulf %21, %21 : vector<8x256xf32>
    %c0_8 = arith.constant 0 : index
    %c0_9 = arith.constant 0 : index
    %23 = vector.load %arg5[%c0_8, %c0_9] : memref<8x1xf32, #tpu.memory_space<vmem>>, vector<8x1xf32>
    %cst_10 = arith.constant dense<0.000000e+00> : vector<8xf32>
    %24 = vector.multi_reduction <add>, %18, %cst_10 [1] : vector<8x256xf32> to vector<8xf32>
    %25 = vector.shape_cast %24 : vector<8xf32> to vector<8x1xf32>
    %26 = arith.addf %23, %25 : vector<8x1xf32>
    %c0_11 = arith.constant 0 : index
    %c0_12 = arith.constant 0 : index
    %27 = vector.load %arg5[%c0_11, %c0_12] : memref<8x1xf32, #tpu.memory_space<vmem>>, vector<8x1xf32>
    tpu.vector_store %arg5[%c0_11, %c0_12], %26 {strides = array<i32>} : memref<8x1xf32, #tpu.memory_space<vmem>>, vector<8x1xf32>,
    %c0_13 = arith.constant 0 : index
    %c0_14 = arith.constant 0 : index
    %28 = vector.load %arg6[%c0_13, %c0_14] : memref<8x1xf32, #tpu.memory_space<vmem>>, vector<8x1xf32>
    %cst_15 = arith.constant dense<0.000000e+00> : vector<8xf32>
    %29 = vector.multi_reduction <add>, %20, %cst_15 [1] : vector<8x256xf32> to vector<8xf32>
    %30 = vector.shape_cast %29 : vector<8xf32> to vector<8x1xf32>
    %31 = arith.addf %28, %30 : vector<8x1xf32>
    %c0_16 = arith.constant 0 : index
    %c0_17 = arith.constant 0 : index
    %32 = vector.load %arg6[%c0_16, %c0_17] : memref<8x1xf32, #tpu.memory_space<vmem>>, vector<8x1xf32>
    tpu.vector_store %arg6[%c0_16, %c0_17], %31 {strides = array<i32>} : memref<8x1xf32, #tpu.memory_space<vmem>>, vector<8x1xf32>,
    %c0_18 = arith.constant 0 : index
    %c0_19 = arith.constant 0 : index
    %33 = vector.load %arg7[%c0_18, %c0_19] : memref<8x1xf32, #tpu.memory_space<vmem>>, vector<8x1xf32>
    %cst_20 = arith.constant dense<0.000000e+00> : vector<8xf32>
    %34 = vector.multi_reduction <add>, %22, %cst_20 [1] : vector<8x256xf32> to vector<8xf32>
    %35 = vector.shape_cast %34 : vector<8xf32> to vector<8x1xf32>
    %36 = arith.addf %33, %35 : vector<8x1xf32>
    %c0_21 = arith.constant 0 : index
    %c0_22 = arith.constant 0 : index
    %37 = vector.load %arg7[%c0_21, %c0_22] : memref<8x1xf32, #tpu.memory_space<vmem>>, vector<8x1xf32>
    tpu.vector_store %arg7[%c0_21, %c0_22], %36 {strides = array<i32>} : memref<8x1xf32, #tpu.memory_space<vmem>>, vector<8x1xf32>,
    %c0_i32_23 = arith.constant 0 : i32
    %38 = arith.cmpi eq, %arg1, %c0_i32_23 : i32
    %39 = arith.extui %38 : i1 to i32
    %c0_i32_24 = arith.constant 0 : i32
    %40 = arith.cmpi ne, %39, %c0_i32_24 : i32
    scf.if %40 {
      %c0_25 = arith.constant 0 : index
      %c0_26 = arith.constant 0 : index
      %41 = vector.load %arg5[%c0_25, %c0_26] : memref<8x1xf32, #tpu.memory_space<vmem>>, vector<8x1xf32>
      %c0_27 = arith.constant 0 : index
      %c0_28 = arith.constant 0 : index
      %42 = vector.load %arg6[%c0_27, %c0_28] : memref<8x1xf32, #tpu.memory_space<vmem>>, vector<8x1xf32>
      %c0_29 = arith.constant 0 : index
      %c0_30 = arith.constant 0 : index
      %43 = vector.load %arg7[%c0_29, %c0_30] : memref<8x1xf32, #tpu.memory_space<vmem>>, vector<8x1xf32>
      %cst_31 = arith.constant 2.000000e+00 : f32
      %44 = vector.broadcast %cst_31 : f32 to vector<8x1xf32>
      %45 = arith.mulf %44, %41 : vector<8x1xf32>
      %cst_32 = arith.constant 1.000000e-07 : f32
      %46 = vector.broadcast %cst_32 : f32 to vector<8x1xf32>
      %47 = arith.addf %45, %46 : vector<8x1xf32>
      %cst_33 = arith.constant 2.000000e+00 : f32
      %48 = vector.broadcast %cst_33 : f32 to vector<8x1xf32>
      %49 = arith.mulf %48, %41 : vector<8x1xf32>
      %50 = arith.addf %49, %42 : vector<8x1xf32>
      %51 = arith.addf %50, %43 : vector<8x1xf32>
      %cst_34 = arith.constant 1.000000e-07 : f32
      %52 = vector.broadcast %cst_34 : f32 to vector<8x1xf32>
      %53 = arith.addf %51, %52 : vector<8x1xf32>
      %54 = arith.divf %47, %53 : vector<8x1xf32>
      %cst_35 = arith.constant 1.000000e+00 : f32
      %55 = vector.broadcast %cst_35 : f32 to vector<8x1xf32>
      %56 = arith.subf %55, %54 : vector<8x1xf32>
      %57 = vector.shape_cast %56 : vector<8x1xf32> to vector<8x1xf32>
      %58 = vector.broadcast %57 : vector<8x1xf32> to vector<8x128xf32>
      %c0_36 = arith.constant 0 : index
      %c0_37 = arith.constant 0 : index
      %59 = vector.load %arg4[%c0_36, %c0_37] : memref<8x128xf32, #tpu.memory_space<vmem>>, vector<8x128xf32>
      tpu.vector_store %arg4[%c0_36, %c0_37], %58 {strides = array<i32>} : memref<8x128xf32, #tpu.memory_space<vmem>>, vector<8x128xf32>,
    } else {
    }
    return
  }
  func.func @transform_0(%arg0: i32, %arg1: i32) -> (i32, i32) {
    %c0_i32 = arith.constant 0 : i32
    return %arg0, %arg1 : i32, i32
  }
  func.func @transform_1(%arg0: i32, %arg1: i32) -> (i32, i32) {
    %c0_i32 = arith.constant 0 : i32
    return %arg0, %arg1 : i32, i32
  }
  func.func @transform_2(%arg0: i32, %arg1: i32) -> (i32, i32) {
    %c0_i32 = arith.constant 0 : i32
    %c0_i32_0 = arith.constant 0 : i32
    return %arg0, %c0_i32 : i32, i32
  }
}

</mosaic_0001>

<bundles_post_ra>
// kernel: tpu_custom_call.1
= control target key start
LH: loop header
LB: loop body
LE: loop exit
PB: predicated region body
PF: predicated region fallthrough
CT: control target
= control target key end

     0   :  { %7 = vsyncpa [#allocation6], 0  ;;  %s310_s0 = inlined_call_operand.hbm [shape: f32[8,256], index: 0, kind: input, shape index: {}]   ;;  %s311_s1 = inlined_call_operand.hbm [shape: f32[8,256], index: 1, kind: input, shape index: {}]   ;;  %s312_s2 = inlined_call_operand.hbm [shape: f32[8,128], index: 2, kind: output, shape index: {}]  }
   0x1   :  { %8 = vsyncpa [#allocation9], 0 }
   0x2   :  { %9 = vsyncpa [#allocation7], 0  ;;  %s15_s11 = sshll.u32 %s310_s0, 4  ;;  %s275_s12 = smov [#allocation5]   ;;  %s16_s11 = int_to_ptr.hbm [resolvable:$true] %s15_s11 }
   0x3   :  { %s17_s13 = sshll.u32 %s275_s12, 4  ;;  %s26_s16 = sshll.u32 %s311_s1, 4  ;;  %s18_s13 = int_to_ptr.vmem [resolvable:$true] %s17_s13  ;;  %s27_s16 = int_to_ptr.hbm [resolvable:$true] %s26_s16 }
   0x4   :  { %20 = dma.hbm_to_vmem [thread:$0]  %s16_s11, 256, %s18_s13, [#allocation6]  }
   0x5   :  { %s276_s17 = smov [#allocation8]  }
   0x6   :  { %s28_s18 = sshll.u32 %s276_s17, 4  ;;  %s29_s18 = int_to_ptr.vmem [resolvable:$true] %s28_s18 }
   0x7   :  { %31 = dma.hbm_to_vmem [thread:$0]  %s27_s16, 256, %s29_s18, [#allocation9]  }
   0x8   :  { %269 = dma.done.wait [#allocation6], 256  }
   0x9   :  { %270 = vsyncadd [#allocation6], 4294967040 }
   0xa   :  { %271 = dma.done.wait [#allocation9], 256  }
   0xb   :  { %272 = vsyncadd [#allocation9], 4294967040  ;;  %v48_v0 = vld [vmem:[#allocation5] sm:$0xff]  ;;  %v49_v1 = vld [vmem:[#allocation5 + $0x8] sm:$0xff]  ;;  %vm44_vm0 = vcmask 7168   ;;  %v277_v8 = vmov 0.0  }
   0xc   :  { %v178_v2 = vmul.f32 -1.442695, %v48_v0  ;;  %v179_v3 = vmul.f32 -1.442695, %v49_v1  ;;  %45 = vst.msk [vmem:[#allocation2] sm:$0xff] %vm44_vm0, %v277_v8  ;;  %v92_v19 = vld [vmem:[#allocation8] sm:$0xff] }
   0xd   :  { %46 = vst.msk [vmem:[#allocation3] sm:$0xff] %vm44_vm0, %v277_v8  ;;  %v93_v21 = vld [vmem:[#allocation8 + $0x8] sm:$0xff]  ;;  %v94_v26 = vmax.f32 %v92_v19, 1e-07  ;;  %v278_v52 = vmov 0   ;;  %s279_s0 = smov [#allocation10]  }
   0xe   :  { %187 = vpow2.f32 %v178_v2  ;;  %47 = vst.msk [vmem:[#allocation4] sm:$0xff] %vm44_vm0, %v277_v8  ;;  %v95_v28 = vmax.f32 %v93_v21, 1e-07  ;;  %185 = vset.pattern.permute.xlu1 %v278_v52  ;;  %186 = vset.pattern.permute.xlu0 %v278_v52  ;;  %s165_s1 = sshll.u32 %s279_s0, 4  ;;  %s167_s21 = sshll.u32 %s312_s2, 4  ;;  %s166_s1 = int_to_ptr.vmem [resolvable:$true] %s165_s1  ;;  %s168_s21 = int_to_ptr.hbm [resolvable:$true] %s167_s21 }
   0xf   :  { %189 = vpow2.f32 %v179_v3  ;;  %v96_v34 = vmin.f32 %v94_v26, 0.9999999 }
  0x10   :  { %v97_v36 = vmin.f32 %v95_v28, 0.9999999 }
  0x13   :  { %v108_v53 = vld [vmem:[#allocation2] sm:$0xff] }
  0x14   :  { %v188_v4 = vpop.eup %187  ;;  %v115_v59 = vld [vmem:[#allocation3] sm:$0xff] }
  0x15   :  { %v190_v5 = vpop.eup %189  ;;  %v56_v6 = vadd.f32 1.0, %v188_v4  ;;  %v121_v56 = vld [vmem:[#allocation4] sm:$0xff] }
  0x16   :  { %v57_v7 = vadd.f32 1.0, %v190_v5 }
  0x17   :  { %191 = vrcp.f32 %v56_v6  ;;  %vm63_vm1 = vweird.f32 %v56_v6  ;;  %v69_v12 = vand.u32 2147483648, %v56_v6  ;;  %v67_v15 = vand.u32 2147483647, %v56_v6 }
  0x18   :  { %193 = vrcp.f32 %v57_v7  ;;  %v84_v16 = vand.u32 2147483648, %v57_v7  ;;  %vm78_vm3 = vweird.f32 %v57_v7  ;;  %v82_v18 = vand.u32 2147483647, %v57_v7 }
  0x19   :  { %v70_v22 = vor.u32 1.1754944e-38, %v69_v12  ;;  %vm68_vm6 = vcmp.eq.f32.partialorder %v67_v15, 8.507059e+37 }
  0x1a   :  { %v85_v25 = vor.u32 1.1754944e-38, %v84_v16  ;;  %vm83_vm8 = vcmp.eq.f32.partialorder %v82_v18, 8.507059e+37 }
  0x1d   :  { %v192_v9 = vpop.eup %191 }
  0x1e   :  { %v194_v10 = vpop.eup %193  ;;  %v59_v11 = vmul.f32 %v192_v9, %v56_v6  ;;  %vm64_vm2 = vweird.f32 %v192_v9 }
  0x1f   :  { %v74_v13 = vmul.f32 %v194_v10, %v57_v7  ;;  %vm79_vm4 = vweird.f32 %v194_v10  ;;  %vm65_vm5 = vmor %vm63_vm1, %vm64_vm2 }
  0x20   :  { %v60_v14 = vsub.f32 1.0, %v59_v11  ;;  %vm80_vm7 = vmor %vm78_vm3, %vm79_vm4 }
  0x21   :  { %v75_v17 = vsub.f32 1.0, %v74_v13 }
  0x22   :  { %v61_v20 = vmul.f32 %v192_v9, %v60_v14 }
  0x23   :  { %v76_v23 = vmul.f32 %v194_v10, %v75_v17 }
  0x24   :  { %v62_v24 = vadd.f32 %v192_v9, %v61_v20 }
  0x25   :  { %v77_v27 = vadd.f32 %v194_v10, %v76_v23 }
  0x26   :  { %v66_v29 = vsel %vm65_vm5, %v192_v9, %v62_v24 }
  0x27   :  { %v71_v30 = vsel %vm68_vm6, %v70_v22, %v66_v29  ;;  %v81_v31 = vsel %vm80_vm7, %v194_v10, %v77_v27 }
  0x28   :  { %v86_v32 = vsel %vm83_vm8, %v85_v25, %v81_v31  ;;  %v88_v33 = vmax.f32 %v71_v30, 1e-07 }
  0x29   :  { %v89_v35 = vmax.f32 %v86_v32, 1e-07 }
  0x2a   :  { %v90_v37 = vmin.f32 %v88_v33, 0.9999999 }
  0x2b   :  { %v91_v38 = vmin.f32 %v89_v35, 0.9999999 }
  0x2c   :  { %v98_v39 = vmul.f32 %v96_v34, %v90_v37 }
  0x2d   :  { %v99_v40 = vmul.f32 %v97_v36, %v91_v38 }
  0x2e   :  { %v100_v41 = vsub.f32 %v96_v34, %v98_v39  ;;  %v104_v42 = vsub.f32 %v90_v37, %v98_v39 }
  0x2f   :  { %v109_v43 = vadd.f32 %v99_v40, %v98_v39  ;;  %v101_v44 = vsub.f32 %v97_v36, %v99_v40  ;;  %v105_v45 = vsub.f32 %v91_v38, %v99_v40 }
  0x30   :  { %v106_v46 = vmul.f32 %v104_v42, %v104_v42  ;;  %v102_v47 = vmul.f32 %v100_v41, %v100_v41 }
  0x31   :  { %110 = vadd.xlane.f32.xlu0 %v109_v43  ;;  %v103_v48 = vmul.f32 %v101_v44, %v101_v44  ;;  %v107_v49 = vmul.f32 %v105_v45, %v105_v45 }
  0x33   :  { %v122_v50 = vadd.f32 %v107_v49, %v106_v46  ;;  %v116_v51 = vadd.f32 %v103_v48, %v102_v47 }
  0x35   :  { %123 = vadd.xlane.f32.xlu1 %v122_v50 }
  0x39   :  { %117 = vadd.xlane.f32.xlu0 %v116_v51 }
  0xa4   :  { %v111_v54 = vpop.xlane.xlu0 %110 }
  0xa5   :  { %v112_v55 = vadd.f32 %v111_v54, %v108_v53 }
  0xa7   :  { %114 = vst.msk [vmem:[#allocation2] sm:$0xff] %vm44_vm0, %v112_v55 }
  0xa8   :  { %v124_v57 = vpop.xlane.xlu1 %123 }
  0xa9   :  { %v125_v58 = vadd.f32 %v124_v57, %v121_v56 }
  0xab   :  { %126 = vst.msk [vmem:[#allocation4] sm:$0xff] %vm44_vm0, %v125_v58 }
  0xac   :  { %v118_v60 = vpop.xlane.xlu0 %117 }
  0xad   :  { %v119_v61 = vadd.f32 %v118_v60, %v115_v59 }
  0xae   :  { %v130_v62 = vld [vmem:[#allocation2] sm:$0xff] }
  0xaf   :  { %120 = vst.msk [vmem:[#allocation3] sm:$0xff] %vm44_vm0, %v119_v61  ;;  %v133_v63 = vmul.f32 2.0, %v130_v62 }
  0xb1   :  { %v134_v13 = vadd.f32 1e-07, %v133_v63 }
  0xb2   :  { %v132_v1 = vld [vmem:[#allocation4] sm:$0xff] }
  0xb6   :  { %v131_v0 = vld [vmem:[#allocation3] sm:$0xff] }
  0xb7   :  { %v135_v2 = vadd.f32 %v133_v63, %v131_v0 }
  0xb9   :  { %v136_v3 = vadd.f32 %v135_v2, %v132_v1 }
  0xbb   :  { %v137_v4 = vadd.f32 1e-07, %v136_v3 }
  0xbd   :  { %195 = vrcp.f32 %v137_v4  ;;  %v149_v8 = vand.u32 2147483648, %v137_v4  ;;  %v147_v10 = vand.u32 2147483647, %v137_v4  ;;  %vm143_vm10 = vweird.f32 %v137_v4 }
  0xbf   :  { %v150_v12 = vor.u32 1.1754944e-38, %v149_v8  ;;  %vm148_vm12 = vcmp.eq.f32.partialorder %v147_v10, 8.507059e+37 }
  0xc3   :  { %v196_v5 = vpop.eup %195 }
  0xc4   :  { %v139_v6 = vmul.f32 %v196_v5, %v137_v4  ;;  %vm144_vm9 = vweird.f32 %v196_v5 }
  0xc5   :  { %vm145_vm11 = vmor %vm143_vm10, %vm144_vm9 }
  0xc6   :  { %v140_v7 = vsub.f32 1.0, %v139_v6 }
  0xc8   :  { %v141_v9 = vmul.f32 %v196_v5, %v140_v7 }
  0xca   :  { %v142_v11 = vadd.f32 %v196_v5, %v141_v9 }
  0xcc   :  { %v146_v14 = vsel %vm145_vm11, %v196_v5, %v142_v11 }
  0xcd   :  { %v151_v15 = vsel %vm148_vm12, %v150_v12, %v146_v14 }
  0xce   :  { %v152_v16 = vmul.f32 %v151_v15, %v134_v13 }
  0xd0   :  { %v153_v17 = vsub.f32 1.0, %v152_v16 }
  0xd2   :  { %156 = vperm.xlu1 %185, %v153_v17  }
 0x144   :  { %v157_v18 = vpop.permute.xlu1 %156 }
 0x145   :  { %159 = vst [vmem:[#allocation10] sm:$0xff] %v157_v18 }
 0x146   :  { %170 = dma.vmem_to_hbm [thread:$0]  %s166_s1, 128, %s168_s21, [#allocation7]  }
 0x147   :  { %273 = dma.done.wait [#allocation7], 128  }
 0x148   :  { %274 = vsyncadd [#allocation7], 4294967168 }
 0x149   :  { %175 = vsyncpa [#allocation6], 1 }
 0x14a   :  { %176 = vsyncpa [#allocation9], 1 }
 0x14b   :  { %177 = vsyncpa [#allocation7], 1 }

</bundles_post_ra>
